<compile_context>
chip_gen: v7x
topology: tpu7x:2x2x1
jax: 0.10.0
libtpu: 0.0.40
codegen_flags: <defaults>
</compile_context>

<pallas_src>
import functools

import jax
import jax.numpy as jnp
from jax.experimental import pallas as pl
from jax.experimental.pallas import tpu as pltpu


def _round_up(x, m):
    return ((x + m - 1) // m) * m


def _cdiv(a, b):
    return -(-a // b)


def _pad_to(a, shape):
    pads = [(0, t - s) for s, t in zip(a.shape, shape)]
    if all(p == (0, 0) for p in pads):
        return a
    return jnp.pad(a, pads)


def _vmem_capacity_bytes():
    """Physical VMEM capacity of the attached chip (conservative fallback)."""
    try:
        return int(pltpu.get_tpu_info().vmem_capacity_bytes)
    except Exception:
        return 64 << 20  # v7x per-core size: the most restrictive generation


# -----------------------------------------------------------------------------
# Kernel
# -----------------------------------------------------------------------------
def _mlp_kernel(x_ref, w1_hbm, b1_hbm, w2_hbm, b2_hbm, w3_hbm, b3_hbm, o_ref,
                w1_v, b1_v, w2_v, b2_v, w3_v, b3_v):
    """Fused 3-layer MLP on one (bb, Gp) batch tile.

    The weights live in HBM (memory_space=pl.ANY) and are DMA'd ONCE into
    persistent VMEM scratch at grid step 0; every subsequent batch tile reuses
    the resident copies (single-buffered: half the VMEM of a pipelined spec).
    """
    @pl.when(pl.program_id(0) == 0)
    def _load_weights_once():
        pltpu.sync_copy(w1_hbm, w1_v)
        pltpu.sync_copy(b1_hbm, b1_v)
        pltpu.sync_copy(w2_hbm, w2_v)
        pltpu.sync_copy(b2_hbm, b2_v)
        pltpu.sync_copy(w3_hbm, w3_v)
        pltpu.sync_copy(b3_hbm, b3_v)

    cd = w1_v.dtype
    # Layer 1: Linear + ReLU   (Dropout p=0.0 is identity -> omitted)
    h1 = jnp.dot(x_ref[...], w1_v[...], preferred_element_type=jnp.float32)
    h1 = jnp.maximum(h1 + b1_v[...], 0.0)
    # Layer 2: Linear + ReLU
    h2 = jnp.dot(h1.astype(cd), w2_v[...], preferred_element_type=jnp.float32)
    h2 = jnp.maximum(h2 + b2_v[...], 0.0)
    # Layer 3: Linear (no activation)
    y = jnp.dot(h2.astype(cd), w3_v[...], preferred_element_type=jnp.float32)
    o_ref[...] = (y + b3_v[...]).astype(o_ref.dtype)


# -----------------------------------------------------------------------------
# Parameter preparation (done ONCE, outside the per-call jit)
# -----------------------------------------------------------------------------
def prepare_mlp_encoder_params(w1, b1, w2, b2, w3, b3,
                               compute_dtype=jnp.bfloat16):
    """Cast weights to the compute dtype and zero-pad all feature dims to 128.

    wN are [in, out] (torch nn.Linear weights pre-transposed), bN are [out].
    Zero padding is exact: padded rows/cols contribute nothing, padded bias
    entries are zero so ReLU keeps them at zero, padded outputs are sliced off.
    """
    G, H1 = w1.shape
    H2 = w2.shape[1]
    HO = w3.shape[1]
    Gp, H1p, H2p, HOp = (_round_up(d, 128) for d in (G, H1, H2, HO))
    cd = compute_dtype
    return {
        "w1": _pad_to(jnp.asarray(w1, cd), (Gp, H1p)),
        "b1": _pad_to(jnp.asarray(b1, jnp.float32).reshape(1, -1), (1, H1p)),
        "w2": _pad_to(jnp.asarray(w2, cd), (H1p, H2p)),
        "b2": _pad_to(jnp.asarray(b2, jnp.float32).reshape(1, -1), (1, H2p)),
        "w3": _pad_to(jnp.asarray(w3, cd), (H2p, HOp)),
        "b3": _pad_to(jnp.asarray(b3, jnp.float32).reshape(1, -1), (1, HOp)),
        "in_dim": G,
        "out_dim": HO,
    }


# -----------------------------------------------------------------------------
# Forward
# -----------------------------------------------------------------------------
@functools.partial(jax.jit, static_argnames=("block_b", "out_dim"))
def _forward_padded(x, w1p, b1p, w2p, b2p, w3p, b3p, *, block_b, out_dim):
    B, _ = x.shape
    Gp, H1p = w1p.shape
    H2p = w2p.shape[1]
    HOp = w3p.shape[1]
    cd = w1p.dtype
    wsz = jnp.dtype(cd).itemsize

    # ---- adaptive batch tile: even split of B into cdiv(B, block_b) steps,
    #      rounded to a multiple of 16 (bf16 sublane packing).  Avoids running
    #      a nearly-empty trailing tile when B is not a multiple of block_b.
    steps = max(1, _cdiv(B, int(block_b)))
    bb = _round_up(max(_cdiv(B, steps), 16), 16)
    Bp = _round_up(B, bb)
    grid = (Bp // bb,)

    xp = _pad_to(x.astype(cd), (Bp, Gp))

    # ---- VMEM budget: single-buffered resident weights + pipelined x/out
    #      tiles (double-buffered) + f32 intermediates, with 25% slack,
    #      capped by the chip's physical VMEM capacity (minus headroom).
    need = (
        wsz * (Gp * H1p + H1p * H2p + H2p * HOp)   # W1..W3 scratch (1 buffer)
        + 4 * (H1p + H2p + HOp)                    # biases (f32 scratch)
        + 2 * bb * Gp * wsz                        # x tile, double-buffered
        + 2 * bb * HOp * 4                         # out tile, double-buffered
        + bb * (H1p + H2p + HOp) * 4               # f32 intermediates
    )
    cap = _vmem_capacity_bytes()
    vmem_limit = min(max(int(need * 5 // 4), 32 << 20), cap - (4 << 20))

    cost = pl.CostEstimate(
        flops=int(2 * Bp * (Gp * H1p + H1p * H2p + H2p * HOp)),
        transcendentals=0,
        bytes_accessed=int(
            Bp * Gp * wsz
            + wsz * (Gp * H1p + H1p * H2p + H2p * HOp)
            + 4 * (H1p + H2p + HOp)
            + Bp * HOp * 4),
    )

    out = pl.pallas_call(
        _mlp_kernel,
        out_shape=jax.ShapeDtypeStruct((Bp, HOp), jnp.float32),
        grid_spec=pltpu.PrefetchScalarGridSpec(
            num_scalar_prefetch=0,
            grid=grid,
            in_specs=[
                pl.BlockSpec((bb, Gp), lambda i: (i, 0)),   # x tile (streamed)
                pl.BlockSpec(memory_space=pl.ANY),          # W1 (HBM, manual DMA)
                pl.BlockSpec(memory_space=pl.ANY),          # b1
                pl.BlockSpec(memory_space=pl.ANY),          # W2
                pl.BlockSpec(memory_space=pl.ANY),          # b2
                pl.BlockSpec(memory_space=pl.ANY),          # W3
                pl.BlockSpec(memory_space=pl.ANY),          # b3
            ],
            out_specs=pl.BlockSpec((bb, HOp), lambda i: (i, 0)),
            scratch_shapes=[
                pltpu.VMEM((Gp, H1p), cd),          # resident W1
                pltpu.VMEM((1, H1p), jnp.float32),  # resident b1
                pltpu.VMEM((H1p, H2p), cd),         # resident W2
                pltpu.VMEM((1, H2p), jnp.float32),  # resident b2
                pltpu.VMEM((H2p, HOp), cd),         # resident W3
                pltpu.VMEM((1, HOp), jnp.float32),  # resident b3
            ],
        ),
        compiler_params=pltpu.CompilerParams(
            # "arbitrary": weights are loaded once at step 0 and reused, so the
            # batch grid must run sequentially on one core (also sidesteps the
            # v7x megacore weight-DMA duplication issue at small batch).
            dimension_semantics=("arbitrary",),
            vmem_limit_bytes=vmem_limit,
        ),
        cost_estimate=cost,
    )(xp, w1p, b1p, w2p, b2p, w3p, b3p)

    return out[:B, :out_dim]


def mlp_encoder_forward(x, params, *, block_b=256):
    """MLPEncoder forward.  x: [B, num_genes] f32, params from
    prepare_mlp_encoder_params().  Returns [B, num_hiddens] f32."""
    assert x.shape[1] == params["in_dim"], "num_genes mismatch"
    return _forward_padded(
        x, params["w1"], params["b1"], params["w2"], params["b2"],
        params["w3"], params["b3"],
        block_b=int(block_b), out_dim=int(params["out_dim"]))


# -----------------------------------------------------------------------------
# Helpers for the demo / reference
# -----------------------------------------------------------------------------
def _init_linear(key, fan_in, fan_out, dtype=jnp.float32):
    """torch.nn.Linear-style init (uniform +-1/sqrt(fan_in)).
    Returns W already transposed to [fan_in, fan_out] and b as [fan_out]."""
    kw, kb = jax.random.split(key)
    bound = 1.0 / (fan_in ** 0.5)
    w = jax.random.uniform(kw, (fan_in, fan_out), dtype, -bound, bound)
    b = jax.random.uniform(kb, (fan_out,), dtype, -bound, bound)
    return w, b


def _reference(x, w1, b1, w2, b2, w3, b3, compute_dtype=jnp.bfloat16):
    """Pure-JAX forward using the same bf16-inputs / f32-accumulate recipe."""
    cd = compute_dtype
    f32 = jnp.float32
    h = jnp.dot(x.astype(cd), w1.astype(cd), preferred_element_type=f32) + b1
    h = jnp.maximum(h, 0.0)
    h = jnp.dot(h.astype(cd), w2.astype(cd), preferred_element_type=f32) + b2
    h = jnp.maximum(h, 0.0)
    return jnp.dot(h.astype(cd), w3.astype(cd), preferred_element_type=f32) + b3


if __name__ == "__main__":
    # Small, TPU-friendly stand-ins for MLPEncoder(num_genes=10000, num_hiddens=128):
    #   num_genes -> 1024 hidden -> num_hiddens -> num_hiddens, scaled down.
    batch = 192          # with block_b=64 -> 3 grid steps (exercises the
                         # load-weights-once-at-step-0 residency path)
    num_genes = 500      # deliberately not a multiple of 128: exercises padding
    hidden1 = 256        # stand-in for 1024
    num_hiddens = 128

    key = jax.random.PRNGKey(0)
    kx, k1, k2, k3 = jax.random.split(key, 4)

    x = jax.random.normal(kx, (batch, num_genes), jnp.float32)
    w1, b1 = _init_linear(k1, num_genes, hidden1)
    w2, b2 = _init_linear(k2, hidden1, num_hiddens)
    w3, b3 = _init_linear(k3, num_hiddens, num_hiddens)

    # One-time weight prep (cast + pad) -- hoisted out of the forward pass.
    params = prepare_mlp_encoder_params(w1, b1, w2, b2, w3, b3)

    # TODO(synk): nn.Dropout(p_drop) with p_drop > 0 would need
    # pltpu.prng_seed + pltpu.stateful_bernoulli; the module default p=0.0 is
    # the identity, so it is intentionally omitted here.
    out = mlp_encoder_forward(x, params, block_b=64)
    out = jax.block_until_ready(out)
    assert out.shape == (batch, num_hiddens)
    assert out.dtype == jnp.float32

    # Pure-JAX reference of the same forward pass; tolerance loosened because
    # weights/activations are bf16 (accumulation is f32 in both paths).
    ref = _reference(x, w1, b1, w2, b2, w3, b3)
    err = float(jnp.max(jnp.abs(out - ref)))
    assert jnp.allclose(out, ref, atol=1e-2, rtol=1e-2), err

    print("KERNEL_OK")
</pallas_src>

<mosaic_0001>
module attributes {stable_mosaic.version = 11 : i64} {
  func.func @_mlp_kernel(%arg0: i32, %arg1: memref<64x512xbf16, #tpu.memory_space<vmem>>, %arg2: memref<512x256xbf16, #tpu.memory_space<any>>, %arg3: memref<1x256xf32, #tpu.memory_space<any>>, %arg4: memref<256x128xbf16, #tpu.memory_space<any>>, %arg5: memref<1x128xf32, #tpu.memory_space<any>>, %arg6: memref<128x128xbf16, #tpu.memory_space<any>>, %arg7: memref<1x128xf32, #tpu.memory_space<any>>, %arg8: memref<64x128xf32, #tpu.memory_space<vmem>>, %arg9: memref<512x256xbf16, #tpu.memory_space<vmem>>, %arg10: memref<1x256xf32, #tpu.memory_space<vmem>>, %arg11: memref<256x128xbf16, #tpu.memory_space<vmem>>, %arg12: memref<1x128xf32, #tpu.memory_space<vmem>>, %arg13: memref<128x128xbf16, #tpu.memory_space<vmem>>, %arg14: memref<1x128xf32, #tpu.memory_space<vmem>>) attributes {dimension_semantics = [#tpu.dimension_semantics<arbitrary>], iteration_bounds = array<i64: 3>, scalar_prefetch = 0 : i64, scratch_operands = 6 : i64, tpu.core_type = #tpu.core_type<tc>, window_params = [{transform_indices = @transform_0, window_bounds = array<i64: 64, 512>}, {}, {}, {}, {}, {}, {}, {transform_indices = @transform_7, window_bounds = array<i64: 64, 128>}]} {
    %c0_i32 = arith.constant 0 : i32
    %0 = arith.cmpi eq, %arg0, %c0_i32 : i32
    %1 = arith.extui %0 : i1 to i32
    %c0_i32_0 = arith.constant 0 : i32
    %2 = arith.cmpi ne, %1, %c0_i32_0 : i32
    scf.if %2 {
      "tpu.region"() ({
        %26 = tpu.sem_alloc : memref<!tpu.dma_semaphore, #tpu.memory_space<semaphore_mem>>
        tpu.enqueue_dma source(%arg2 : memref<512x256xbf16, #tpu.memory_space<any>>) target(%arg9 : memref<512x256xbf16, #tpu.memory_space<vmem>>) target_semaphore(%26 : memref<!tpu.dma_semaphore, #tpu.memory_space<semaphore_mem>>)
        tpu.wait_dma2 semaphore(%26 : memref<!tpu.dma_semaphore, #tpu.memory_space<semaphore_mem>>) src(%arg2 : memref<512x256xbf16, #tpu.memory_space<any>>) dst(%arg9 : memref<512x256xbf16, #tpu.memory_space<vmem>>)
        tpu.yield
      }) : () -> ()
      "tpu.region"() ({
        %26 = tpu.sem_alloc : memref<!tpu.dma_semaphore, #tpu.memory_space<semaphore_mem>>
        tpu.enqueue_dma source(%arg3 : memref<1x256xf32, #tpu.memory_space<any>>) target(%arg10 : memref<1x256xf32, #tpu.memory_space<vmem>>) target_semaphore(%26 : memref<!tpu.dma_semaphore, #tpu.memory_space<semaphore_mem>>)
        tpu.wait_dma2 semaphore(%26 : memref<!tpu.dma_semaphore, #tpu.memory_space<semaphore_mem>>) src(%arg3 : memref<1x256xf32, #tpu.memory_space<any>>) dst(%arg10 : memref<1x256xf32, #tpu.memory_space<vmem>>)
        tpu.yield
      }) : () -> ()
      "tpu.region"() ({
        %26 = tpu.sem_alloc : memref<!tpu.dma_semaphore, #tpu.memory_space<semaphore_mem>>
        tpu.enqueue_dma source(%arg4 : memref<256x128xbf16, #tpu.memory_space<any>>) target(%arg11 : memref<256x128xbf16, #tpu.memory_space<vmem>>) target_semaphore(%26 : memref<!tpu.dma_semaphore, #tpu.memory_space<semaphore_mem>>)
        tpu.wait_dma2 semaphore(%26 : memref<!tpu.dma_semaphore, #tpu.memory_space<semaphore_mem>>) src(%arg4 : memref<256x128xbf16, #tpu.memory_space<any>>) dst(%arg11 : memref<256x128xbf16, #tpu.memory_space<vmem>>)
        tpu.yield
      }) : () -> ()
      "tpu.region"() ({
        %26 = tpu.sem_alloc : memref<!tpu.dma_semaphore, #tpu.memory_space<semaphore_mem>>
        tpu.enqueue_dma source(%arg5 : memref<1x128xf32, #tpu.memory_space<any>>) target(%arg12 : memref<1x128xf32, #tpu.memory_space<vmem>>) target_semaphore(%26 : memref<!tpu.dma_semaphore, #tpu.memory_space<semaphore_mem>>)
        tpu.wait_dma2 semaphore(%26 : memref<!tpu.dma_semaphore, #tpu.memory_space<semaphore_mem>>) src(%arg5 : memref<1x128xf32, #tpu.memory_space<any>>) dst(%arg12 : memref<1x128xf32, #tpu.memory_space<vmem>>)
        tpu.yield
      }) : () -> ()
      "tpu.region"() ({
        %26 = tpu.sem_alloc : memref<!tpu.dma_semaphore, #tpu.memory_space<semaphore_mem>>
        tpu.enqueue_dma source(%arg6 : memref<128x128xbf16, #tpu.memory_space<any>>) target(%arg13 : memref<128x128xbf16, #tpu.memory_space<vmem>>) target_semaphore(%26 : memref<!tpu.dma_semaphore, #tpu.memory_space<semaphore_mem>>)
        tpu.wait_dma2 semaphore(%26 : memref<!tpu.dma_semaphore, #tpu.memory_space<semaphore_mem>>) src(%arg6 : memref<128x128xbf16, #tpu.memory_space<any>>) dst(%arg13 : memref<128x128xbf16, #tpu.memory_space<vmem>>)
        tpu.yield
      }) : () -> ()
      "tpu.region"() ({
        %26 = tpu.sem_alloc : memref<!tpu.dma_semaphore, #tpu.memory_space<semaphore_mem>>
        tpu.enqueue_dma source(%arg7 : memref<1x128xf32, #tpu.memory_space<any>>) target(%arg14 : memref<1x128xf32, #tpu.memory_space<vmem>>) target_semaphore(%26 : memref<!tpu.dma_semaphore, #tpu.memory_space<semaphore_mem>>)
        tpu.wait_dma2 semaphore(%26 : memref<!tpu.dma_semaphore, #tpu.memory_space<semaphore_mem>>) src(%arg7 : memref<1x128xf32, #tpu.memory_space<any>>) dst(%arg14 : memref<1x128xf32, #tpu.memory_space<vmem>>)
        tpu.yield
      }) : () -> ()
    } else {
    }
    %c0 = arith.constant 0 : index
    %c0_1 = arith.constant 0 : index
    %3 = vector.load %arg1[%c0, %c0_1] : memref<64x512xbf16, #tpu.memory_space<vmem>>, vector<64x512xbf16>
    %c0_2 = arith.constant 0 : index
    %c0_3 = arith.constant 0 : index
    %4 = vector.load %arg9[%c0_2, %c0_3] : memref<512x256xbf16, #tpu.memory_space<vmem>>, vector<512x256xbf16>
    %cst = arith.constant dense<0.000000e+00> : vector<64x256xf32>
    %5 = tpu.matmul %3, %4, %cst {dimension_numbers = #tpu.dot_dimension_numbers<[1], [0], [0], [1], [0, 0, 1, 1], [], []>} : vector<64x512xbf16>, vector<512x256xbf16>, vector<64x256xf32> -> vector<64x256xf32>
    %c0_4 = arith.constant 0 : index
    %c0_5 = arith.constant 0 : index
    %6 = vector.load %arg10[%c0_4, %c0_5] : memref<1x256xf32, #tpu.memory_space<vmem>>, vector<1x256xf32>
    %7 = vector.broadcast %6 : vector<1x256xf32> to vector<64x256xf32>
    %8 = arith.addf %5, %7 : vector<64x256xf32>
    %cst_6 = arith.constant 0.000000e+00 : f32
    %9 = vector.broadcast %cst_6 : f32 to vector<64x256xf32>
    %10 = arith.maximumf %8, %9 : vector<64x256xf32>
    %11 = arith.truncf %10 : vector<64x256xf32> to vector<64x256xbf16>
    %c0_7 = arith.constant 0 : index
    %c0_8 = arith.constant 0 : index
    %12 = vector.load %arg11[%c0_7, %c0_8] : memref<256x128xbf16, #tpu.memory_space<vmem>>, vector<256x128xbf16>
    %cst_9 = arith.constant dense<0.000000e+00> : vector<64x128xf32>
    %13 = tpu.matmul %11, %12, %cst_9 {dimension_numbers = #tpu.dot_dimension_numbers<[1], [0], [0], [1], [0, 0, 1, 1], [], []>} : vector<64x256xbf16>, vector<256x128xbf16>, vector<64x128xf32> -> vector<64x128xf32>
    %c0_10 = arith.constant 0 : index
    %c0_11 = arith.constant 0 : index
    %14 = vector.load %arg12[%c0_10, %c0_11] : memref<1x128xf32, #tpu.memory_space<vmem>>, vector<1x128xf32>
    %15 = vector.broadcast %14 : vector<1x128xf32> to vector<64x128xf32>
    %16 = arith.addf %13, %15 : vector<64x128xf32>
    %cst_12 = arith.constant 0.000000e+00 : f32
    %17 = vector.broadcast %cst_12 : f32 to vector<64x128xf32>
    %18 = arith.maximumf %16, %17 : vector<64x128xf32>
    %19 = arith.truncf %18 : vector<64x128xf32> to vector<64x128xbf16>
    %c0_13 = arith.constant 0 : index
    %c0_14 = arith.constant 0 : index
    %20 = vector.load %arg13[%c0_13, %c0_14] : memref<128x128xbf16, #tpu.memory_space<vmem>>, vector<128x128xbf16>
    %cst_15 = arith.constant dense<0.000000e+00> : vector<64x128xf32>
    %21 = tpu.matmul %19, %20, %cst_15 {dimension_numbers = #tpu.dot_dimension_numbers<[1], [0], [0], [1], [0, 0, 1, 1], [], []>} : vector<64x128xbf16>, vector<128x128xbf16>, vector<64x128xf32> -> vector<64x128xf32>
    %c0_16 = arith.constant 0 : index
    %c0_17 = arith.constant 0 : index
    %22 = vector.load %arg14[%c0_16, %c0_17] : memref<1x128xf32, #tpu.memory_space<vmem>>, vector<1x128xf32>
    %23 = vector.broadcast %22 : vector<1x128xf32> to vector<64x128xf32>
    %24 = arith.addf %21, %23 : vector<64x128xf32>
    %c0_18 = arith.constant 0 : index
    %c0_19 = arith.constant 0 : index
    %25 = vector.load %arg8[%c0_18, %c0_19] : memref<64x128xf32, #tpu.memory_space<vmem>>, vector<64x128xf32>
    tpu.vector_store %arg8[%c0_18, %c0_19], %24 {strides = array<i32>} : memref<64x128xf32, #tpu.memory_space<vmem>>, vector<64x128xf32>,
    return
  }
  func.func @transform_0(%arg0: i32) -> (i32, i32) {
    %c0_i32 = arith.constant 0 : i32
    %c0_i32_0 = arith.constant 0 : i32
    return %arg0, %c0_i32 : i32, i32
  }
  func.func @transform_7(%arg0: i32) -> (i32, i32) {
    %c0_i32 = arith.constant 0 : i32
    %c0_i32_0 = arith.constant 0 : i32
    return %arg0, %c0_i32 : i32, i32
  }
}

</mosaic_0001>

<bundles_post_ra>
// kernel: _forward_padded.1
= control target key start
LH: loop header
LB: loop body
LE: loop exit
PB: predicated region body
PF: predicated region fallthrough
CT: control target
= control target key end

     0   :  { %12 = vsyncpa [#allocation9], 0  ;;  %s2493_s0 = inlined_call_operand.vmem [shape: bf16[192,512], index: 0, kind: input, shape index: {}]   ;;  %s2494_s1 = inlined_call_operand.vmem [shape: bf16[512,256], index: 1, kind: input, shape index: {}]   ;;  %s2495_s2 = inlined_call_operand.vmem [shape: f32[1,256], index: 2, kind: input, shape index: {}]   ;;  %s2496_s3 = inlined_call_operand.vmem [shape: bf16[256,128], index: 3, kind: input, shape index: {}]   ;;  %s2497_s4 = inlined_call_operand.vmem [shape: f32[1,128], index: 4, kind: input, shape index: {}]   ;;  %s2498_s5 = inlined_call_operand.vmem [shape: bf16[128,128], index: 5, kind: input, shape index: {}]   ;;  %s2499_s6 = inlined_call_operand.vmem [shape: f32[1,128], index: 6, kind: input, shape index: {}]   ;;  %s2500_s7 = inlined_call_operand.hbm [shape: f32[192,128], index: 7, kind: output, shape index: {}]  }
   0x1   :  { %14 = vsyncpa [#allocation9 + $0x1], 0  ;;  %s1965_s24 = smov 0   ;;  %s1967_s25 = smov 0  }
   0x2   :  { %s1969_s26 = smov 0   ;;  %s1971_s27 = smov 0  }
   0x3 LB: > { %s1986_s28 = sadd.s32 4294967295, %s1920_s27   ;;  %s1639_s29 = sadd.s32 4294967294, %s1920_s27   ;;  %s1920_s27 = sphi %s1971_s27, %s2506_s27   ;;  %s1916_s26 = sphi %s1969_s26, %s2505_s26   ;;  %s1912_s25 = sphi %s1967_s25, %s2504_s25   ;;  %s1908_s24 = sphi %s1965_s24, %s2503_s24  }
   0x4   : > { %s1990_s30 = sadd.s32 1, %s1920_s27   ;;  %s53_s8 = sadd.s32 1, %s1916_s26 }
   0x5   : > { %s50_s9 = ssub.s32 %s1920_s27, %s1990_s30  ;;  %p63_p0 = scmp.ne.s32.totalorder %s1916_s26, %s1912_s25 }
   0x6   : > { %p51_p1 = scmp.eq.s32.totalorder %s50_s9, 0  ;;  %p64_p2 = scmp.eq.s32.totalorder %s1986_s28, 2 }
   0x7   : > { %p69_p3 = scmp.ne.s32.totalorder %s1912_s25, %s1908_s24  ;;  %p70_p4 = scmp.eq.s32.totalorder %s1639_s29, 2 }
   0x8   : > { %s2001_s10 = scalar_select %p51_p1, %s1916_s26, %s53_s8  }
   0x9   : > { %p2003_p5 = por %p64_p2, %p63_p0  ;;  %p2007_p6 = por %p70_p4, %p69_p3 }
   0xa   : > { %p1642_p7 = scmp.ge.s32.totalorder %s1920_s27, 1  ;;  %p98_p8 = scmp.lt.s32.totalorder %s1920_s27, 4 }
   0xc   : > { %p99_p9 = pnand %p1642_p7, %p98_p8 }
   0xd   : > { %s116_s13 = sand.u32 (!%p99_p9), 1, %s1912_s25   ;;  %s1644_s14 = sshll.u32 (!%p99_p9), %s1986_s28, 3 }
   0xe   : > { %102 = sbr.rel (%p99_p9) target bundleno = 889 (0x379), region = 24  ;;  %s1643_s15 = sshll.u32 (!%p99_p9), %s116_s13, 6 }
   0xf   : > { %p120_p10 = scmp.lt.s32.totalorder (!%p99_p9), %s1644_s14, 23  ;;  %s2022_s20 = scalar_lea.vmem (!%p99_p9), [#allocation8], %s1643_s15 }
  0x10   : > { %p1647_p11 = scmp.ne.s32.totalorder (!%p99_p9), %s1986_s28, 0 }
  0x15   : > { %s2508_s14 = smov (!%p120_p10, %s1644_s14), 23  ;;  %131 = sbr.rel (%p1647_p11) target bundleno = 121 (0x79), region = 28 }
  0x16   : > { %s1671_s16 = sshll.u32 %s2508_s14, 4 }
  0x17   : > { %s2020_s19 = scalar_lea.vmem %s2493_s0, %s1671_s16 }
  0x1c   : > { %v149_v0 = vld [vmem:[%s2494_s1] sm:$0xf]  ;;  %v151_v1 = vld [vmem:[%s2494_s1 + $0x8] sm:$0xf]  ;;  %v153_v2 = vld [vmem:[%s2494_s1 + $0x4] sm:$0xf] }
  0x1d   : > { %150 = vst [vmem:[#allocation2] sm:$0xf] %v149_v0  ;;  %152 = vst [vmem:[#allocation2 + $0x4] sm:$0xf] %v151_v1  ;;  %v155_v3 = vld [vmem:[%s2494_s1 + $0xc] sm:$0xff]   ;;  %v163_v6 = vld [vmem:[%s2494_s1 + $0x1c] sm:$0xff]  }
  0x1e   : > { %154 = vst [vmem:[#allocation2 + $0x8] sm:$0xf] %v153_v2  ;;  %v159_v4 = vld [vmem:[%s2494_s1 + $0x18] sm:$0xf]  ;;  %v161_v5 = vld [vmem:[%s2494_s1 + $0x14] sm:$0xf] }
  0x1f   : > { %156 = vst [vmem:[#allocation2 + $0xc] sm:$0xff] %v155_v3   ;;  %160 = vst [vmem:[#allocation2 + $0x14] sm:$0xf] %v159_v4  ;;  %v167_v7 = vld [vmem:[%s2494_s1 + $0x28] sm:$0xf]  ;;  %v171_v9 = vld [vmem:[%s2494_s1 + $0x2c] sm:$0xff]  }
  0x20   : > { %162 = vst [vmem:[#allocation2 + $0x18] sm:$0xf] %v161_v5  ;;  %v169_v8 = vld [vmem:[%s2494_s1 + $0x24] sm:$0xf]  ;;  %164 = vst [vmem:[#allocation2 + $0x1c] sm:$0xff] %v163_v6   ;;  %v179_v12 = vld [vmem:[%s2494_s1 + $0x3c] sm:$0xff]  }
  0x21   : > { %168 = vst [vmem:[#allocation2 + $0x24] sm:$0xf] %v167_v7  ;;  %170 = vst [vmem:[#allocation2 + $0x28] sm:$0xf] %v169_v8  ;;  %v175_v10 = vld [vmem:[%s2494_s1 + $0x38] sm:$0xf] }
  0x22   : > { %v177_v11 = vld [vmem:[%s2494_s1 + $0x34] sm:$0xf]  ;;  %172 = vst [vmem:[#allocation2 + $0x2c] sm:$0xff] %v171_v9   ;;  %176 = vst [vmem:[#allocation2 + $0x34] sm:$0xf] %v175_v10  ;;  %v187_v15 = vld [vmem:[%s2494_s1 + $0x4c] sm:$0xff]  }
  0x23   : > { %178 = vst [vmem:[#allocation2 + $0x38] sm:$0xf] %v177_v11  ;;  %v183_v13 = vld [vmem:[%s2494_s1 + $0x48] sm:$0xf]  ;;  %v185_v14 = vld [vmem:[%s2494_s1 + $0x44] sm:$0xf] }
  0x24   : > { %180 = vst [vmem:[#allocation2 + $0x3c] sm:$0xff] %v179_v12   ;;  %184 = vst [vmem:[#allocation2 + $0x44] sm:$0xf] %v183_v13  ;;  %v191_v16 = vld [vmem:[%s2494_s1 + $0x58] sm:$0xf]  ;;  %v195_v18 = vld [vmem:[%s2494_s1 + $0x5c] sm:$0xff]  }
  0x25   : > { %186 = vst [vmem:[#allocation2 + $0x48] sm:$0xf] %v185_v14  ;;  %v193_v17 = vld [vmem:[%s2494_s1 + $0x54] sm:$0xf]  ;;  %188 = vst [vmem:[#allocation2 + $0x4c] sm:$0xff] %v187_v15   ;;  %v203_v21 = vld [vmem:[%s2494_s1 + $0x6c] sm:$0xff]  }
  0x26   : > { %192 = vst [vmem:[#allocation2 + $0x54] sm:$0xf] %v191_v16  ;;  %194 = vst [vmem:[#allocation2 + $0x58] sm:$0xf] %v193_v17  ;;  %v199_v19 = vld [vmem:[%s2494_s1 + $0x68] sm:$0xf] }
  0x27   : > { %v201_v20 = vld [vmem:[%s2494_s1 + $0x64] sm:$0xf]  ;;  %196 = vst [vmem:[#allocation2 + $0x5c] sm:$0xff] %v195_v18   ;;  %200 = vst [vmem:[#allocation2 + $0x64] sm:$0xf] %v199_v19  ;;  %v211_v24 = vld [vmem:[%s2494_s1 + $0x7c] sm:$0xff]  }
  0x28   : > { %202 = vst [vmem:[#allocation2 + $0x68] sm:$0xf] %v201_v20  ;;  %v207_v22 = vld [vmem:[%s2494_s1 + $0x78] sm:$0xf]  ;;  %v209_v23 = vld [vmem:[%s2494_s1 + $0x74] sm:$0xf] }
  0x29   : > { %204 = vst [vmem:[#allocation2 + $0x6c] sm:$0xff] %v203_v21   ;;  %208 = vst [vmem:[#allocation2 + $0x74] sm:$0xf] %v207_v22  ;;  %v215_v25 = vld [vmem:[%s2494_s1 + $0x88] sm:$0xf]  ;;  %v219_v27 = vld [vmem:[%s2494_s1 + $0x8c] sm:$0xff]  }
  0x2a   : > { %210 = vst [vmem:[#allocation2 + $0x78] sm:$0xf] %v209_v23  ;;  %v217_v26 = vld [vmem:[%s2494_s1 + $0x84] sm:$0xf]  ;;  %212 = vst [vmem:[#allocation2 + $0x7c] sm:$0xff] %v211_v24   ;;  %v227_v30 = vld [vmem:[%s2494_s1 + $0x9c] sm:$0xff]  }
  0x2b   : > { %216 = vst [vmem:[#allocation2 + $0x84] sm:$0xf] %v215_v25  ;;  %218 = vst [vmem:[#allocation2 + $0x88] sm:$0xf] %v217_v26  ;;  %v223_v28 = vld [vmem:[%s2494_s1 + $0x98] sm:$0xf] }
  0x2c   : > { %v225_v29 = vld [vmem:[%s2494_s1 + $0x94] sm:$0xf]  ;;  %220 = vst [vmem:[#allocation2 + $0x8c] sm:$0xff] %v219_v27   ;;  %224 = vst [vmem:[#allocation2 + $0x94] sm:$0xf] %v223_v28  ;;  %v235_v33 = vld [vmem:[%s2494_s1 + $0xac] sm:$0xff]  }
  0x2d   : > { %226 = vst [vmem:[#allocation2 + $0x98] sm:$0xf] %v225_v29  ;;  %v231_v31 = vld [vmem:[%s2494_s1 + $0xa8] sm:$0xf]  ;;  %v233_v32 = vld [vmem:[%s2494_s1 + $0xa4] sm:$0xf] }
  0x2e   : > { %228 = vst [vmem:[#allocation2 + $0x9c] sm:$0xff] %v227_v30   ;;  %232 = vst [vmem:[#allocation2 + $0xa4] sm:$0xf] %v231_v31  ;;  %v239_v34 = vld [vmem:[%s2494_s1 + $0xb8] sm:$0xf]  ;;  %v243_v36 = vld [vmem:[%s2494_s1 + $0xbc] sm:$0xff]  }
  0x2f   : > { %234 = vst [vmem:[#allocation2 + $0xa8] sm:$0xf] %v233_v32  ;;  %v241_v35 = vld [vmem:[%s2494_s1 + $0xb4] sm:$0xf]  ;;  %236 = vst [vmem:[#allocation2 + $0xac] sm:$0xff] %v235_v33   ;;  %v251_v39 = vld [vmem:[%s2494_s1 + $0xcc] sm:$0xff]  }
  0x30   : > { %240 = vst [vmem:[#allocation2 + $0xb4] sm:$0xf] %v239_v34  ;;  %242 = vst [vmem:[#allocation2 + $0xb8] sm:$0xf] %v241_v35  ;;  %v247_v37 = vld [vmem:[%s2494_s1 + $0xc8] sm:$0xf] }
  0x31   : > { %v249_v38 = vld [vmem:[%s2494_s1 + $0xc4] sm:$0xf]  ;;  %244 = vst [vmem:[#allocation2 + $0xbc] sm:$0xff] %v243_v36   ;;  %248 = vst [vmem:[#allocation2 + $0xc4] sm:$0xf] %v247_v37  ;;  %v259_v42 = vld [vmem:[%s2494_s1 + $0xdc] sm:$0xff]  }
  0x32   : > { %250 = vst [vmem:[#allocation2 + $0xc8] sm:$0xf] %v249_v38  ;;  %v255_v40 = vld [vmem:[%s2494_s1 + $0xd8] sm:$0xf]  ;;  %v257_v41 = vld [vmem:[%s2494_s1 + $0xd4] sm:$0xf] }
  0x33   : > { %252 = vst [vmem:[#allocation2 + $0xcc] sm:$0xff] %v251_v39   ;;  %256 = vst [vmem:[#allocation2 + $0xd4] sm:$0xf] %v255_v40  ;;  %v263_v43 = vld [vmem:[%s2494_s1 + $0xe8] sm:$0xf]  ;;  %v267_v45 = vld [vmem:[%s2494_s1 + $0xec] sm:$0xff]  }
  0x34   : > { %258 = vst [vmem:[#allocation2 + $0xd8] sm:$0xf] %v257_v41  ;;  %v265_v44 = vld [vmem:[%s2494_s1 + $0xe4] sm:$0xf]  ;;  %260 = vst [vmem:[#allocation2 + $0xdc] sm:$0xff] %v259_v42   ;;  %v275_v48 = vld [vmem:[%s2494_s1 + $0xfc] sm:$0xff]  }
  0x35   : > { %264 = vst [vmem:[#allocation2 + $0xe4] sm:$0xf] %v263_v43  ;;  %266 = vst [vmem:[#allocation2 + $0xe8] sm:$0xf] %v265_v44  ;;  %v271_v46 = vld [vmem:[%s2494_s1 + $0xf8] sm:$0xf] }
  0x36   : > { %v273_v47 = vld [vmem:[%s2494_s1 + $0xf4] sm:$0xf]  ;;  %268 = vst [vmem:[#allocation2 + $0xec] sm:$0xff] %v267_v45   ;;  %272 = vst [vmem:[#allocation2 + $0xf4] sm:$0xf] %v271_v46  ;;  %v283_v51 = vld [vmem:[%s2494_s1 + $0x10c] sm:$0xff]  }
  0x37   : > { %274 = vst [vmem:[#allocation2 + $0xf8] sm:$0xf] %v273_v47  ;;  %v279_v49 = vld [vmem:[%s2494_s1 + $0x108] sm:$0xf]  ;;  %v281_v50 = vld [vmem:[%s2494_s1 + $0x104] sm:$0xf] }
  0x38   : > { %276 = vst [vmem:[#allocation2 + $0xfc] sm:$0xff] %v275_v48   ;;  %280 = vst [vmem:[#allocation2 + $0x104] sm:$0xf] %v279_v49  ;;  %v287_v52 = vld [vmem:[%s2494_s1 + $0x118] sm:$0xf]  ;;  %v291_v54 = vld [vmem:[%s2494_s1 + $0x11c] sm:$0xff]  }
  0x39   : > { %282 = vst [vmem:[#allocation2 + $0x108] sm:$0xf] %v281_v50  ;;  %v289_v53 = vld [vmem:[%s2494_s1 + $0x114] sm:$0xf]  ;;  %284 = vst [vmem:[#allocation2 + $0x10c] sm:$0xff] %v283_v51   ;;  %v299_v57 = vld [vmem:[%s2494_s1 + $0x12c] sm:$0xff]  }
  0x3a   : > { %288 = vst [vmem:[#allocation2 + $0x114] sm:$0xf] %v287_v52  ;;  %290 = vst [vmem:[#allocation2 + $0x118] sm:$0xf] %v289_v53  ;;  %v295_v55 = vld [vmem:[%s2494_s1 + $0x128] sm:$0xf] }
  0x3b   : > { %v297_v56 = vld [vmem:[%s2494_s1 + $0x124] sm:$0xf]  ;;  %292 = vst [vmem:[#allocation2 + $0x11c] sm:$0xff] %v291_v54   ;;  %296 = vst [vmem:[#allocation2 + $0x124] sm:$0xf] %v295_v55  ;;  %v307_v60 = vld [vmem:[%s2494_s1 + $0x13c] sm:$0xff]  }
  0x3c   : > { %298 = vst [vmem:[#allocation2 + $0x128] sm:$0xf] %v297_v56  ;;  %v303_v58 = vld [vmem:[%s2494_s1 + $0x138] sm:$0xf]  ;;  %v305_v59 = vld [vmem:[%s2494_s1 + $0x134] sm:$0xf] }
  0x3d   : > { %300 = vst [vmem:[#allocation2 + $0x12c] sm:$0xff] %v299_v57   ;;  %304 = vst [vmem:[#allocation2 + $0x134] sm:$0xf] %v303_v58  ;;  %v311_v61 = vld [vmem:[%s2494_s1 + $0x148] sm:$0xf]  ;;  %v315_v63 = vld [vmem:[%s2494_s1 + $0x14c] sm:$0xff]  }
  0x3e   : > { %306 = vst [vmem:[#allocation2 + $0x138] sm:$0xf] %v305_v59  ;;  %v313_v62 = vld [vmem:[%s2494_s1 + $0x144] sm:$0xf]  ;;  %308 = vst [vmem:[#allocation2 + $0x13c] sm:$0xff] %v307_v60   ;;  %v323_v2 = vld [vmem:[%s2494_s1 + $0x15c] sm:$0xff]  }
  0x3f   : > { %312 = vst [vmem:[#allocation2 + $0x144] sm:$0xf] %v311_v61  ;;  %314 = vst [vmem:[#allocation2 + $0x148] sm:$0xf] %v313_v62  ;;  %v319_v0 = vld [vmem:[%s2494_s1 + $0x158] sm:$0xf] }
  0x40   : > { %v321_v1 = vld [vmem:[%s2494_s1 + $0x154] sm:$0xf]  ;;  %316 = vst [vmem:[#allocation2 + $0x14c] sm:$0xff] %v315_v63   ;;  %320 = vst [vmem:[#allocation2 + $0x154] sm:$0xf] %v319_v0  ;;  %v331_v5 = vld [vmem:[%s2494_s1 + $0x16c] sm:$0xff]  }
  0x41   : > { %322 = vst [vmem:[#allocation2 + $0x158] sm:$0xf] %v321_v1  ;;  %v327_v3 = vld [vmem:[%s2494_s1 + $0x168] sm:$0xf]  ;;  %v329_v4 = vld [vmem:[%s2494_s1 + $0x164] sm:$0xf] }
  0x42   : > { %324 = vst [vmem:[#allocation2 + $0x15c] sm:$0xff] %v323_v2   ;;  %328 = vst [vmem:[#allocation2 + $0x164] sm:$0xf] %v327_v3  ;;  %v335_v6 = vld [vmem:[%s2494_s1 + $0x178] sm:$0xf]  ;;  %v339_v8 = vld [vmem:[%s2494_s1 + $0x17c] sm:$0xff]  }
  0x43   : > { %330 = vst [vmem:[#allocation2 + $0x168] sm:$0xf] %v329_v4  ;;  %v337_v7 = vld [vmem:[%s2494_s1 + $0x174] sm:$0xf]  ;;  %332 = vst [vmem:[#allocation2 + $0x16c] sm:$0xff] %v331_v5   ;;  %v347_v11 = vld [vmem:[%s2494_s1 + $0x18c] sm:$0xff]  }
  0x44   : > { %336 = vst [vmem:[#allocation2 + $0x174] sm:$0xf] %v335_v6  ;;  %338 = vst [vmem:[#allocation2 + $0x178] sm:$0xf] %v337_v7  ;;  %v343_v9 = vld [vmem:[%s2494_s1 + $0x188] sm:$0xf] }
  0x45   : > { %v345_v10 = vld [vmem:[%s2494_s1 + $0x184] sm:$0xf]  ;;  %340 = vst [vmem:[#allocation2 + $0x17c] sm:$0xff] %v339_v8   ;;  %344 = vst [vmem:[#allocation2 + $0x184] sm:$0xf] %v343_v9  ;;  %v355_v14 = vld [vmem:[%s2494_s1 + $0x19c] sm:$0xff]  }
  0x46   : > { %346 = vst [vmem:[#allocation2 + $0x188] sm:$0xf] %v345_v10  ;;  %v351_v12 = vld [vmem:[%s2494_s1 + $0x198] sm:$0xf]  ;;  %v353_v13 = vld [vmem:[%s2494_s1 + $0x194] sm:$0xf] }
  0x47   : > { %348 = vst [vmem:[#allocation2 + $0x18c] sm:$0xff] %v347_v11   ;;  %352 = vst [vmem:[#allocation2 + $0x194] sm:$0xf] %v351_v12  ;;  %v359_v15 = vld [vmem:[%s2494_s1 + $0x1a8] sm:$0xf]  ;;  %v363_v17 = vld [vmem:[%s2494_s1 + $0x1ac] sm:$0xff]  }
  0x48   : > { %354 = vst [vmem:[#allocation2 + $0x198] sm:$0xf] %v353_v13  ;;  %v361_v16 = vld [vmem:[%s2494_s1 + $0x1a4] sm:$0xf]  ;;  %356 = vst [vmem:[#allocation2 + $0x19c] sm:$0xff] %v355_v14   ;;  %v371_v20 = vld [vmem:[%s2494_s1 + $0x1bc] sm:$0xff]  }
  0x49   : > { %360 = vst [vmem:[#allocation2 + $0x1a4] sm:$0xf] %v359_v15  ;;  %362 = vst [vmem:[#allocation2 + $0x1a8] sm:$0xf] %v361_v16  ;;  %v367_v18 = vld [vmem:[%s2494_s1 + $0x1b8] sm:$0xf] }
  0x4a   : > { %v369_v19 = vld [vmem:[%s2494_s1 + $0x1b4] sm:$0xf]  ;;  %364 = vst [vmem:[#allocation2 + $0x1ac] sm:$0xff] %v363_v17   ;;  %368 = vst [vmem:[#allocation2 + $0x1b4] sm:$0xf] %v367_v18  ;;  %v379_v23 = vld [vmem:[%s2494_s1 + $0x1cc] sm:$0xff]  }
  0x4b   : > { %370 = vst [vmem:[#allocation2 + $0x1b8] sm:$0xf] %v369_v19  ;;  %v375_v21 = vld [vmem:[%s2494_s1 + $0x1c8] sm:$0xf]  ;;  %v377_v22 = vld [vmem:[%s2494_s1 + $0x1c4] sm:$0xf] }
  0x4c   : > { %372 = vst [vmem:[#allocation2 + $0x1bc] sm:$0xff] %v371_v20   ;;  %376 = vst [vmem:[#allocation2 + $0x1c4] sm:$0xf] %v375_v21  ;;  %v383_v24 = vld [vmem:[%s2494_s1 + $0x1d8] sm:$0xf]  ;;  %v387_v26 = vld [vmem:[%s2494_s1 + $0x1dc] sm:$0xff]  }
  0x4d   : > { %378 = vst [vmem:[#allocation2 + $0x1c8] sm:$0xf] %v377_v22  ;;  %v385_v25 = vld [vmem:[%s2494_s1 + $0x1d4] sm:$0xf]  ;;  %380 = vst [vmem:[#allocation2 + $0x1cc] sm:$0xff] %v379_v23   ;;  %v395_v29 = vld [vmem:[%s2494_s1 + $0x1ec] sm:$0xff]  }
  0x4e   : > { %384 = vst [vmem:[#allocation2 + $0x1d4] sm:$0xf] %v383_v24  ;;  %386 = vst [vmem:[#allocation2 + $0x1d8] sm:$0xf] %v385_v25  ;;  %v391_v27 = vld [vmem:[%s2494_s1 + $0x1e8] sm:$0xf] }
  0x4f   : > { %v393_v28 = vld [vmem:[%s2494_s1 + $0x1e4] sm:$0xf]  ;;  %388 = vst [vmem:[#allocation2 + $0x1dc] sm:$0xff] %v387_v26   ;;  %392 = vst [vmem:[#allocation2 + $0x1e4] sm:$0xf] %v391_v27 }
  0x50   : > { %394 = vst [vmem:[#allocation2 + $0x1e8] sm:$0xf] %v393_v28  ;;  %v399_v30 = vld [vmem:[%s2494_s1 + $0x1f8] sm:$0xf]  ;;  %v401_v31 = vld [vmem:[%s2494_s1 + $0x1f4] sm:$0xf] }
  0x51   : > { %396 = vst [vmem:[#allocation2 + $0x1ec] sm:$0xff] %v395_v29   ;;  %400 = vst [vmem:[#allocation2 + $0x1f4] sm:$0xf] %v399_v30  ;;  %v403_v32 = vld [vmem:[%s2494_s1 + $0x1fc] sm:$0xf] }
  0x52   : > { %402 = vst [vmem:[#allocation2 + $0x1f8] sm:$0xf] %v401_v31  ;;  %404 = vst [vmem:[#allocation2 + $0x1fc] sm:$0xf] %v403_v32 }
  0x53   : > { %691 = vsyncadd [#allocation10], 8192 }
  0x54   : > { %1890 = dma.done.wait [#allocation10], 8192 }
  0x55   : > { %1891 = vsyncadd [#allocation10], 4294959104 }
  0x56   : > { %v713_v33 = vld [vmem:[%s2495_s2] sm:$0x3] }
  0x57   : > { %714 = vst [vmem:[#allocation3] sm:$0x3] %v713_v33 }
  0x58   : > { %739 = vsyncadd [#allocation12], 32 }
  0x59   : > { %1892 = dma.done.wait [#allocation12], 32 }
  0x5a   : > { %1893 = vsyncadd [#allocation12], 4294967264 }
  0x5b   : > { %v775_v34 = vld [vmem:[%s2496_s3] sm:$0xff]  ;;  %v777_v35 = vld [vmem:[%s2496_s3 + $0x8] sm:$0xff]  ;;  %v779_v36 = vld [vmem:[%s2496_s3 + $0x10] sm:$0xff] }
  0x5c   : > { %776 = vst [vmem:[#allocation4] sm:$0xff] %v775_v34  ;;  %778 = vst [vmem:[#allocation4 + $0x8] sm:$0xff] %v777_v35  ;;  %v781_v37 = vld [vmem:[%s2496_s3 + $0x18] sm:$0xff]  ;;  %v783_v38 = vld [vmem:[%s2496_s3 + $0x20] sm:$0xff] }
  0x5d   : > { %780 = vst [vmem:[#allocation4 + $0x10] sm:$0xff] %v779_v36  ;;  %v785_v39 = vld [vmem:[%s2496_s3 + $0x28] sm:$0xff]  ;;  %782 = vst [vmem:[#allocation4 + $0x18] sm:$0xff] %v781_v37  ;;  %v787_v40 = vld [vmem:[%s2496_s3 + $0x30] sm:$0xff] }
  0x5e   : > { %784 = vst [vmem:[#allocation4 + $0x20] sm:$0xff] %v783_v38  ;;  %786 = vst [vmem:[#allocation4 + $0x28] sm:$0xff] %v785_v39  ;;  %v789_v41 = vld [vmem:[%s2496_s3 + $0x38] sm:$0xff]  ;;  %v791_v42 = vld [vmem:[%s2496_s3 + $0x40] sm:$0xff] }
  0x5f   : > { %788 = vst [vmem:[#allocation4 + $0x30] sm:$0xff] %v787_v40  ;;  %790 = vst [vmem:[#allocation4 + $0x38] sm:$0xff] %v789_v41  ;;  %v793_v43 = vld [vmem:[%s2496_s3 + $0x48] sm:$0xff]  ;;  %v795_v44 = vld [vmem:[%s2496_s3 + $0x50] sm:$0xff] }
  0x60   : > { %792 = vst [vmem:[#allocation4 + $0x40] sm:$0xff] %v791_v42  ;;  %v797_v45 = vld [vmem:[%s2496_s3 + $0x58] sm:$0xff]  ;;  %794 = vst [vmem:[#allocation4 + $0x48] sm:$0xff] %v793_v43  ;;  %v799_v46 = vld [vmem:[%s2496_s3 + $0x60] sm:$0xff] }
  0x61   : > { %796 = vst [vmem:[#allocation4 + $0x50] sm:$0xff] %v795_v44  ;;  %798 = vst [vmem:[#allocation4 + $0x58] sm:$0xff] %v797_v45  ;;  %v801_v47 = vld [vmem:[%s2496_s3 + $0x68] sm:$0xff]  ;;  %v803_v48 = vld [vmem:[%s2496_s3 + $0x70] sm:$0xff] }
  0x62   : > { %800 = vst [vmem:[#allocation4 + $0x60] sm:$0xff] %v799_v46  ;;  %802 = vst [vmem:[#allocation4 + $0x68] sm:$0xff] %v801_v47  ;;  %v805_v49 = vld [vmem:[%s2496_s3 + $0x78] sm:$0xff] }
  0x63   : > { %804 = vst [vmem:[#allocation4 + $0x70] sm:$0xff] %v803_v48  ;;  %806 = vst [vmem:[#allocation4 + $0x78] sm:$0xff] %v805_v49 }
  0x64   : > { %814 = vsyncadd [#allocation14], 2048 }
  0x65   : > { %1894 = dma.done.wait [#allocation14], 2048 }
  0x66   : > { %1895 = vsyncadd [#allocation14], 4294965248 }
  0x67   : > { %v836_v50 = vld [vmem:[%s2497_s4] sm:$0x1] }
  0x68   : > { %837 = vst [vmem:[#allocation5] sm:$0x1] %v836_v50 }
  0x69   : > { %862 = vsyncadd [#allocation16], 16 }
  0x6a   : > { %1896 = dma.done.wait [#allocation16], 16 }
  0x6b   : > { %1897 = vsyncadd [#allocation16], 4294967280 }
  0x6c   : > { %v898_v51 = vld [vmem:[%s2498_s5] sm:$0xff]  ;;  %v900_v52 = vld [vmem:[%s2498_s5 + $0x8] sm:$0xff]  ;;  %v902_v53 = vld [vmem:[%s2498_s5 + $0x10] sm:$0xff] }
  0x6d   : > { %899 = vst [vmem:[#allocation6] sm:$0xff] %v898_v51  ;;  %901 = vst [vmem:[#allocation6 + $0x8] sm:$0xff] %v900_v52  ;;  %v904_v54 = vld [vmem:[%s2498_s5 + $0x18] sm:$0xff]  ;;  %v906_v55 = vld [vmem:[%s2498_s5 + $0x20] sm:$0xff] }
  0x6e   : > { %903 = vst [vmem:[#allocation6 + $0x10] sm:$0xff] %v902_v53  ;;  %v908_v56 = vld [vmem:[%s2498_s5 + $0x28] sm:$0xff]  ;;  %905 = vst [vmem:[#allocation6 + $0x18] sm:$0xff] %v904_v54  ;;  %v910_v57 = vld [vmem:[%s2498_s5 + $0x30] sm:$0xff] }
  0x6f   : > { %907 = vst [vmem:[#allocation6 + $0x20] sm:$0xff] %v906_v55  ;;  %909 = vst [vmem:[#allocation6 + $0x28] sm:$0xff] %v908_v56  ;;  %v912_v58 = vld [vmem:[%s2498_s5 + $0x38] sm:$0xff] }
  0x70   : > { %911 = vst [vmem:[#allocation6 + $0x30] sm:$0xff] %v910_v57  ;;  %913 = vst [vmem:[#allocation6 + $0x38] sm:$0xff] %v912_v58 }
  0x71   : > { %921 = vsyncadd [#allocation18], 1024 }
  0x72   : > { %1898 = dma.done.wait [#allocation18], 1024 }
  0x73   : > { %1899 = vsyncadd [#allocation18], 4294966272 }
  0x74   : > { %v943_v59 = vld [vmem:[%s2499_s6] sm:$0x1] }
  0x75   : > { %944 = vst [vmem:[#allocation7] sm:$0x1] %v943_v59 }
  0x76   : > { %969 = vsyncadd [#allocation20], 16 }
  0x77   : > { %1900 = dma.done.wait [#allocation20], 16 }
  0x78   : > { %1901 = vsyncadd [#allocation20], 4294967280 }
  0x79 PF: > { %v990_v60 = vld [vmem:[#allocation2 + $0x8] sm:$0xff]  ;;  %v989_v62 = vld [vmem:[#allocation2] sm:$0xff]  ;;  %v992_v0 = vld [vmem:[#allocation2 + $0x18] sm:$0xff]  ;;  %s1517_s14 = sshll.u32 %s2022_s20, 4  ;;  %s1922_s21 = smov [#allocation8]   ;;  %s2445_s14 = int_to_ptr.vmem [resolvable:$true] %s1517_s14 }
  0x7a   : > { %v1022_v61 = vld [vmem:[#allocation2 + $0x108] sm:$0xff]  ;;  %1145 = vmatprep.subr.bf16.mxu1 %v990_v60  ;;  %v1021_v63 = vld [vmem:[#allocation2 + $0x100] sm:$0xff]  ;;  %v1024_v1 = vld [vmem:[#allocation2 + $0x118] sm:$0xff]  ;;  %s1846_s18 = scalar_lea.vmem %s2445_s14, 1024  ;;  %s1850_s22 = sshll.u32 %s1922_s21, 4  ;;  %s1851_s22 = int_to_ptr.vmem [resolvable:$false] %s1850_s22 }
  0x7b   : > { %1218 = vmatprep.subr.bf16.mxu0 %v1022_v61  ;;  %1146 = vmatpush1.bf16.msra.mxu1 %v989_v62  ;;  %v991_v2 = vld [vmem:[#allocation2 + $0x10] sm:$0xff]  ;;  %v994_v4 = vld [vmem:[#allocation2 + $0x28] sm:$0xff]  ;;  %v993_v6 = vld [vmem:[#allocation2 + $0x20] sm:$0xff]  ;;  %p1847_p12 = scmp.ne.s32.totalorder %s2445_s14, %s1846_s18  ;;  %s1852_s23 = scalar_lea.vmem %s1851_s22, 2048 }
  0x7c   : > { %1219 = vmatpush1.bf16.msra.mxu0 %v1021_v63  ;;  %1147 = vmatprep.subr.bf16.mxu1 %v992_v0  ;;  %v1023_v3 = vld [vmem:[#allocation2 + $0x110] sm:$0xff]  ;;  %v1026_v5 = vld [vmem:[#allocation2 + $0x128] sm:$0xff]  ;;  %v1025_v7 = vld [vmem:[#allocation2 + $0x120] sm:$0xff]  ;;  %p1853_p1 = scmp.lt.s32.totalorder %s2445_s14, %s1851_s22  ;;  %p1854_p2 = scmp.lt.s32.totalorder %s1852_s23, %s1846_s18 }
  0x7d   : > { %1220 = vmatprep.subr.bf16.mxu0 %v1024_v1  ;;  %v996_v8 = vld [vmem:[#allocation2 + $0x38] sm:$0xff]  ;;  %v995_v10 = vld [vmem:[#allocation2 + $0x30] sm:$0xff]  ;;  %v998_v12 = vld [vmem:[#allocation2 + $0x48] sm:$0xff]  ;;  %p1848_p13 = pnand %p1847_p12, %p2003_p5 }
  0x7e   : > { %v1028_v9 = vld [vmem:[#allocation2 + $0x138] sm:$0xff]  ;;  %v1027_v11 = vld [vmem:[#allocation2 + $0x130] sm:$0xff]  ;;  %v1030_v13 = vld [vmem:[#allocation2 + $0x148] sm:$0xff]  ;;  %p1855_p3 = por %p1854_p2, %p1853_p1 }
  0x7f   : > { %1148 = vmatpush1.bf16.msra.mxu1 %v991_v2  ;;  %v997_v14 = vld [vmem:[#allocation2 + $0x40] sm:$0xff]  ;;  %v1000_v16 = vld [vmem:[#allocation2 + $0x58] sm:$0xff]  ;;  %v999_v18 = vld [vmem:[#allocation2 + $0x50] sm:$0xff]  ;;  %p1849_p0 = pneg %p1848_p13 }
  0x80   : > { %1221 = vmatpush1.bf16.msra.mxu0 %v1023_v3  ;;  %1149 = vmatprep.subr.bf16.mxu1 %v994_v4  ;;  %v1029_v15 = vld [vmem:[#allocation2 + $0x140] sm:$0xff]  ;;  %v1032_v17 = vld [vmem:[#allocation2 + $0x158] sm:$0xff]  ;;  %v1031_v19 = vld [vmem:[#allocation2 + $0x150] sm:$0xff] }
  0x81   : > { %1222 = vmatprep.subr.bf16.mxu0 %v1026_v5  ;;  %v1002_v20 = vld [vmem:[#allocation2 + $0x68] sm:$0xff]  ;;  %v1001_v22 = vld [vmem:[#allocation2 + $0x60] sm:$0xff]  ;;  %v1004_v25 = vld [vmem:[#allocation2 + $0x78] sm:$0xff]  ;;  %p1856_p4 = pnand %p1855_p3, %p1849_p0 }
  0x82   : > { %v1034_v21 = vld [vmem:[#allocation2 + $0x168] sm:$0xff]  ;;  %v1033_v23 = vld [vmem:[#allocation2 + $0x160] sm:$0xff]  ;;  %v1036_v27 = vld [vmem:[#allocation2 + $0x178] sm:$0xff] }
  0x83   : > { %1150 = vmatpush1.bf16.msra.mxu1 %v993_v6  ;;  %v1824_v24 = vld [vmem:[%s2020_s19 + $0x4] ss:$16 sps:$4 sm:$0xff]   ;;  %v1827_v26 = vld [vmem:[%s2020_s19 + $0xc] ss:$16 sps:$4 sm:$0xff]   ;;  %v1822_v63 = vld [vmem:[%s2020_s19] ss:$16 sps:$4 sm:$0xff]  }
  0x84   : > { %1223 = vmatpush1.bf16.msra.mxu0 %v1025_v7  ;;  %1151 = vmatprep.subr.bf16.mxu1 %v996_v8  ;;  %v1003_v28 = vld [vmem:[#allocation2 + $0x70] sm:$0xff]  ;;  %v1006_v30 = vld [vmem:[#allocation2 + $0x88] sm:$0xff]  ;;  %v1005_v32 = vld [vmem:[#allocation2 + $0x80] sm:$0xff] }
  0x85   : > { %1224 = vmatprep.subr.bf16.mxu0 %v1028_v9  ;;  %1177 = vmatprep.mubr.bf16.mxu1 %v1824_v24  ;;  %v1035_v29 = vld [vmem:[#allocation2 + $0x170] sm:$0xff]  ;;  %v1038_v31 = vld [vmem:[#allocation2 + $0x188] sm:$0xff]  ;;  %v1037_v33 = vld [vmem:[#allocation2 + $0x180] sm:$0xff] }
  0x86   : > { %1250 = vmatprep.mubr.bf16.mxu0 %v1827_v26  ;;  %v1008_v34 = vld [vmem:[#allocation2 + $0x98] sm:$0xff]  ;;  %v1007_v36 = vld [vmem:[#allocation2 + $0x90] sm:$0xff]  ;;  %v1010_v38 = vld [vmem:[#allocation2 + $0xa8] sm:$0xff] }
  0x87   : > { %1152 = vmatpush1.bf16.msra.mxu1 %v995_v10  ;;  %v1040_v35 = vld [vmem:[#allocation2 + $0x198] sm:$0xff]  ;;  %v1039_v37 = vld [vmem:[#allocation2 + $0x190] sm:$0xff]  ;;  %v1042_v39 = vld [vmem:[#allocation2 + $0x1a8] sm:$0xff] }
  0x88   : > { %1225 = vmatpush1.bf16.msra.mxu0 %v1027_v11  ;;  %1153 = vmatprep.subr.bf16.mxu1 %v998_v12  ;;  %v1009_v40 = vld [vmem:[#allocation2 + $0xa0] sm:$0xff]  ;;  %v1012_v42 = vld [vmem:[#allocation2 + $0xb8] sm:$0xff]  ;;  %v1011_v44 = vld [vmem:[#allocation2 + $0xb0] sm:$0xff] }
  0x89   : > { %1226 = vmatprep.subr.bf16.mxu0 %v1030_v13  ;;  %v1041_v41 = vld [vmem:[#allocation2 + $0x1a0] sm:$0xff]  ;;  %v1044_v43 = vld [vmem:[#allocation2 + $0x1b8] sm:$0xff]  ;;  %v1043_v45 = vld [vmem:[#allocation2 + $0x1b0] sm:$0xff] }
  0x8a   : > { %v1014_v46 = vld [vmem:[#allocation2 + $0xc8] sm:$0xff]  ;;  %v1013_v48 = vld [vmem:[#allocation2 + $0xc0] sm:$0xff]  ;;  %v1016_v50 = vld [vmem:[#allocation2 + $0xd8] sm:$0xff] }
  0x8b   : > { %1154 = vmatpush1.bf16.msra.mxu1 %v997_v14  ;;  %v1046_v47 = vld [vmem:[#allocation2 + $0x1c8] sm:$0xff]  ;;  %v1045_v49 = vld [vmem:[#allocation2 + $0x1c0] sm:$0xff]  ;;  %v1048_v51 = vld [vmem:[#allocation2 + $0x1d8] sm:$0xff] }
  0x8c   : > { %1227 = vmatpush1.bf16.msra.mxu0 %v1029_v15  ;;  %1155 = vmatprep.subr.bf16.mxu1 %v1000_v16  ;;  %v1015_v52 = vld [vmem:[#allocation2 + $0xd0] sm:$0xff]  ;;  %v1018_v54 = vld [vmem:[#allocation2 + $0xe8] sm:$0xff]  ;;  %v1017_v56 = vld [vmem:[#allocation2 + $0xe0] sm:$0xff] }
  0x8d   : > { %1228 = vmatprep.subr.bf16.mxu0 %v1032_v17  ;;  %v1047_v53 = vld [vmem:[#allocation2 + $0x1d0] sm:$0xff]  ;;  %v1050_v55 = vld [vmem:[#allocation2 + $0x1e8] sm:$0xff]  ;;  %v1049_v57 = vld [vmem:[#allocation2 + $0x1e0] sm:$0xff] }
  0x8e   : > { %v1020_v58 = vld [vmem:[#allocation2 + $0xf8] sm:$0xff]  ;;  %v1019_v60 = vld [vmem:[#allocation2 + $0xf0] sm:$0xff]  ;;  %v1323_v62 = vld [vmem:[#allocation4 + $0x40] sm:$0xff] }
  0x8f   : > { %1156 = vmatpush1.bf16.msra.mxu1 %v999_v18  ;;  %v1052_v59 = vld [vmem:[#allocation2 + $0x1f8] sm:$0xff]  ;;  %v1051_v61 = vld [vmem:[#allocation2 + $0x1f0] sm:$0xff]  ;;  %v1315_v3 = vld [vmem:[#allocation4] sm:$0xff] }
  0x90   : > { %1229 = vmatpush1.bf16.msra.mxu0 %v1031_v19  ;;  %1157 = vmatprep.subr.bf16.mxu1 %v1002_v20  ;;  %v1825_v0 = vld [vmem:[%s2020_s19 + $0x8] ss:$16 sps:$4 sm:$0xff]   ;;  %v1828_v1 = vld [vmem:[%s2020_s19 + $0x24] ss:$16 sps:$4 sm:$0xff]   ;;  %v1830_v2 = vld [vmem:[%s2020_s19 + $0x2c] ss:$16 sps:$4 sm:$0xff]  }
  0x91   : > { %1230 = vmatprep.subr.bf16.mxu0 %v1034_v21  ;;  %v1324_v4 = vld [vmem:[#allocation4 + $0x48] sm:$0xff]  ;;  %v1325_v8 = vld [vmem:[#allocation4 + $0x50] sm:$0xff]  ;;  %v1326_v12 = vld [vmem:[#allocation4 + $0x58] sm:$0xff] }
  0x92   : > { %v1316_v5 = vld [vmem:[#allocation4 + $0x8] sm:$0xff]  ;;  %v1834_v9 = vld [vmem:[%s2020_s19 + $0x44] ss:$16 sps:$4 sm:$0xff]   ;;  %v1318_v13 = vld [vmem:[#allocation4 + $0x18] sm:$0xff] }
  0x93   : > { %1158 = vmatpush1.bf16.msra.mxu1 %v1001_v22  ;;  %v1832_v6 = vld [vmem:[%s2020_s19 + $0x20] ss:$16 sps:$4 sm:$0xff]   ;;  %v1833_v7 = vld [vmem:[%s2020_s19 + $0x28] ss:$16 sps:$4 sm:$0xff]   ;;  %v1836_v10 = vld [vmem:[%s2020_s19 + $0x4c] ss:$16 sps:$4 sm:$0xff]  }
  0x94   : > { %1231 = vmatpush1.bf16.msra.mxu0 %v1033_v23  ;;  %1159 = vmatprep.subr.bf16.mxu1 %v1004_v25  ;;  %v1317_v11 = vld [vmem:[#allocation4 + $0x10] sm:$0xff]  ;;  %v1327_v16 = vld [vmem:[#allocation4 + $0x60] sm:$0xff]  ;;  %v1842_v18 = vld [vmem:[%s2020_s19 + $0x6c] ss:$16 sps:$4 sm:$0xff]  }
  0x95   : > { %1232 = vmatprep.subr.bf16.mxu0 %v1036_v27  ;;  %v1838_v14 = vld [vmem:[%s2020_s19 + $0x40] ss:$16 sps:$4 sm:$0xff]   ;;  %v1839_v15 = vld [vmem:[%s2020_s19 + $0x48] ss:$16 sps:$4 sm:$0xff]   ;;  %v1840_v17 = vld [vmem:[%s2020_s19 + $0x64] ss:$16 sps:$4 sm:$0xff]  }
  0x96   : > { %v1319_v19 = vld [vmem:[#allocation4 + $0x20] sm:$0xff]  ;;  %v1328_v22 = vld [vmem:[#allocation4 + $0x68] sm:$0xff]  ;;  %v1329_v24 = vld [vmem:[#allocation4 + $0x70] sm:$0xff] }
  0x97   : > { %1160 = vmatpush1.bf16.msra.mxu1 %v1003_v28  ;;  %v1844_v20 = vld [vmem:[%s2020_s19 + $0x60] ss:$16 sps:$4 sm:$0xff]   ;;  %v1845_v21 = vld [vmem:[%s2020_s19 + $0x68] ss:$16 sps:$4 sm:$0xff]   ;;  %s1672_s19 = sshll.u32 %s1986_s28, 10  ;;  %s2452_s28 = scalar_lea.sflag [#allocation9], %s116_s13 }
  0x98   : > { %1233 = vmatpush1.bf16.msra.mxu0 %v1035_v29  ;;  %1161 = vmatprep.subr.bf16.mxu1 %v1006_v30  ;;  %v1320_v23 = vld [vmem:[#allocation4 + $0x28] sm:$0xff]  ;;  %v1321_v25 = vld [vmem:[#allocation4 + $0x30] sm:$0xff]  ;;  %v1330_v26 = vld [vmem:[#allocation4 + $0x78] sm:$0xff]  ;;  %s2443_s17 = scalar_lea.hbm %s2500_s7, %s1672_s19 }
  0x99   : > { %1234 = vmatprep.subr.bf16.mxu0 %v1038_v31  ;;  %v1322_v27 = vld [vmem:[#allocation4 + $0x38] sm:$0xff]  ;;  %v1415_v28 = vld [vmem:[#allocation6] sm:$0xff]  ;;  %v1416_v29 = vld [vmem:[#allocation6 + $0x8] sm:$0xff]  ;;  %v1055_v31 = vlaneseq }
  0x9a   : > { %v1417_v30 = vld [vmem:[#allocation6 + $0x10] sm:$0xff] }
  0x9b   : > { %1162 = vmatpush1.bf16.msra.mxu1 %v1005_v32  ;;  %v1056_v32 = vshrl.u32 %v1055_v31, 7 }
  0x9c   : > { %1235 = vmatpush1.bf16.msra.mxu0 %v1037_v33  ;;  %1163 = vmatprep.subr.bf16.mxu1 %v1008_v34  ;;  %v1053_v34 = vld [vmem:[#allocation3] sm:$0x3] }
  0x9d   : > { %1236 = vmatprep.subr.bf16.mxu0 %v1040_v35  ;;  %v1057_v33 = vsub.s32 0, %v1056_v32  ;;  %v1061_v35 = vsub.s32 1, %v1056_v32 }
  0x9f   : > { %1164 = vmatpush1.bf16.msra.mxu1 %v1007_v36  ;;  %v2413_v36 = vrot.slane %v1053_v34, %v1057_v33 }
  0xa0   : > { %1237 = vmatpush1.bf16.msra.mxu0 %v1039_v37  ;;  %1165 = vmatprep.subr.bf16.mxu1 %v1010_v38  ;;  %v2415_v37 = vrot.slane %v1053_v34, %v1061_v35 }
  0xa1   : > { %1238 = vmatprep.subr.bf16.mxu0 %v1042_v39 }
  0xa3   : > { %1166 = vmatpush1.bf16.msra.mxu1 %v1009_v40 }
  0xa4   : > { %1239 = vmatpush1.bf16.msra.mxu0 %v1041_v41  ;;  %1167 = vmatprep.subr.bf16.mxu1 %v1012_v42 }
  0xa5   : > { %1240 = vmatprep.subr.bf16.mxu0 %v1044_v43 }
  0xa7   : > { %1168 = vmatpush1.bf16.msra.mxu1 %v1011_v44 }
  0xa8   : > { %1241 = vmatpush1.bf16.msra.mxu0 %v1043_v45  ;;  %1169 = vmatprep.subr.bf16.mxu1 %v1014_v46 }
  0xa9   : > { %1242 = vmatprep.subr.bf16.mxu0 %v1046_v47 }
  0xab   : > { %1170 = vmatpush1.bf16.msra.mxu1 %v1013_v48 }
  0xac   : > { %1243 = vmatpush1.bf16.msra.mxu0 %v1045_v49  ;;  %1171 = vmatprep.subr.bf16.mxu1 %v1016_v50 }
  0xad   : > { %1244 = vmatprep.subr.bf16.mxu0 %v1048_v51 }
  0xaf   : > { %1172 = vmatpush1.bf16.msra.mxu1 %v1015_v52 }
  0xb0   : > { %1245 = vmatpush1.bf16.msra.mxu0 %v1047_v53  ;;  %1173 = vmatprep.subr.bf16.mxu1 %v1018_v54 }
  0xb1   : > { %1246 = vmatprep.subr.bf16.mxu0 %v1050_v55 }
  0xb3   : > { %1174 = vmatpush1.bf16.msra.mxu1 %v1017_v56 }
  0xb4   : > { %1247 = vmatpush1.bf16.msra.mxu0 %v1049_v57  ;;  %1175 = vmatprep.subr.bf16.mxu1 %v1020_v58 }
  0xb5   : > { %1248 = vmatprep.subr.bf16.mxu0 %v1052_v59 }
  0xb7   : > { %1176 = vmatpush1.bf16.msra.mxu1 %v1019_v60 }
  0xb8   : > { %1249 = vmatpush1.bf16.msra.mxu0 %v1051_v61  ;;  %1725 = vmatprep.subr.bf16.mxu1 %v1415_v28 }
  0xb9   : > { %1673 = vmatprep.subr.bf16.mxu0 %v1323_v62 }
  0xba   : > { %1178 = vmatmul.mubr.bf16.vlgmr.msra.gmra.mrb[0].mxu1 %v1822_v63 }
  0xbb   : > { %1251 = vmatmul.mubr.bf16.vlgmr.msra.gmra.mrb[0].mxu0 %v1825_v0  ;;  %1187 = vmatprep.mubr.bf16.mxu1 %v1828_v1 }
  0xbc   : > { %1260 = vmatprep.mubr.bf16.mxu0 %v1830_v2  ;;  %1674 = vmatpush3.bf16.msra.mxu0 %v1315_v3 }
  0xbd   : > { %1675 = vmatprep.subr.bf16.mxu0 %v1324_v4  ;;  %1726 = vmatpush3.bf16.msra.mxu1 %v1415_v28 }
  0xbe   : > { %1727 = vmatprep.subr.bf16.mxu1 %v1416_v29 }
  0xc0   : > { %1676 = vmatpush3.bf16.msra.mxu0 %v1316_v5 }
  0xc1   : > { %1677 = vmatprep.subr.bf16.mxu0 %v1325_v8  ;;  %1728 = vmatpush3.bf16.msra.mxu1 %v1416_v29 }
  0xc2   : > { %1188 = vmatmul.mubr.bf16.gmra.mrb[4].mxu1 %v1832_v6  ;;  %1729 = vmatprep.subr.bf16.mxu1 %v1417_v30 }
  0xc3   : > { %1261 = vmatmul.mubr.bf16.gmra.mrb[4].mxu0 %v1833_v7  ;;  %1197 = vmatprep.mubr.bf16.mxu1 %v1834_v9 }
  0xc4   : > { %1270 = vmatprep.mubr.bf16.mxu0 %v1836_v10  ;;  %1678 = vmatpush3.bf16.msra.mxu0 %v1317_v11 }
  0xc5   : > { %1679 = vmatprep.subr.bf16.mxu0 %v1326_v12  ;;  %1730 = vmatpush3.bf16.msra.mxu1 %v1417_v30 }
  0xc8   : > { %1680 = vmatpush3.bf16.msra.mxu0 %v1318_v13 }
  0xc9   : > { %1681 = vmatprep.subr.bf16.mxu0 %v1327_v16 }
  0xca   : > { %1198 = vmatmul.mubr.bf16.gmra.mrb[8].mxu1 %v1838_v14 }
  0xcb   : > { %1271 = vmatmul.mubr.bf16.gmra.mrb[8].mxu0 %v1839_v15  ;;  %1207 = vmatprep.mubr.bf16.mxu1 %v1840_v17 }
  0xcc   : > { %1280 = vmatprep.mubr.bf16.mxu0 %v1842_v18  ;;  %1682 = vmatpush3.bf16.msra.mxu0 %v1319_v19 }
  0xcd   : > { %1683 = vmatprep.subr.bf16.mxu0 %v1328_v22 }
  0xd0   : > { %1684 = vmatpush3.bf16.msra.mxu0 %v1320_v23 }
  0xd1   : > { %1685 = vmatprep.subr.bf16.mxu0 %v1329_v24 }
  0xd2   : > { %1208 = vmatmul.mubr.bf16.gmra.mrb[12].mxu1 %v1844_v20 }
  0xd3   : > { %1281 = vmatmul.mubr.bf16.gmra.mrb[12].mxu0 %v1845_v21 }
  0xd4   : > { %1686 = vmatpush3.bf16.msra.mxu0 %v1321_v25 }
  0xd5   : > { %1687 = vmatprep.subr.bf16.mxu0 %v1330_v26 }
  0xd8   : > { %1688 = vmatpush3.bf16.msra.mxu0 %v1322_v27 }
 0x18d   : > { %v1179_v38 = vpop.f32.mrb[0].mxu1 }
 0x18e   : > { %v1252_v39 = vpop.f32.mrb[0].mxu0  ;;  %v1180_v40 = vadd.f32 %v1179_v38, %v2413_v36  ;;  %v1181_v41 = vpop.f32.mrb[1].mxu1 }
 0x18f   : > { %v1254_v42 = vpop.f32.mrb[1].mxu0  ;;  %v1182_v43 = vadd.f32 %v1181_v41, %v2415_v37  ;;  %v1183_v44 = vpop.f32.mrb[2].mxu1 }
 0x190   : > { %v1256_v45 = vpop.f32.mrb[2].mxu0  ;;  %v1253_v46 = vadd.f32 %v1252_v39, %v1180_v40  ;;  %v1184_v47 = vadd.f32 %v1183_v44, %v2413_v36  ;;  %v1185_v48 = vpop.f32.mrb[3].mxu1 }
 0x191   : > { %v1258_v49 = vpop.f32.mrb[3].mxu0  ;;  %v1255_v50 = vadd.f32 %v1254_v42, %v1182_v43  ;;  %v1186_v51 = vadd.f32 %v1185_v48, %v2415_v37 }
 0x192   : > { %v1257_v52 = vadd.f32 %v1256_v45, %v1184_v47  ;;  %v1291_v54 = vmax.f32 %v1253_v46, 0.0 }
 0x193   : > { %v1259_v53 = vadd.f32 %v1258_v49, %v1186_v51  ;;  %v1292_v56 = vmax.f32 %v1255_v50, 0.0 }
 0x194   : > { %v1293_v55 = vmax.f32 %v1257_v52, 0.0 }
 0x195   : > { %v1294_v57 = vmax.f32 %v1259_v53, 0.0  ;;  %v1189_v58 = vpop.f32.mrb[4].mxu1 }
 0x196   : > { %v1262_v59 = vpop.f32.mrb[4].mxu0  ;;  %v1307_v60 = vpack.c.bf16 %v1293_v55, %v1291_v54  ;;  %v1190_v61 = vadd.f32 %v1189_v58, %v2413_v36  ;;  %v1191_v62 = vpop.f32.mrb[5].mxu1 }
 0x197   : > { %v1264_v63 = vpop.f32.mrb[5].mxu0  ;;  %v1308_v0 = vpack.c.bf16 %v1294_v57, %v1292_v56  ;;  %v1192_v1 = vadd.f32 %v1191_v62, %v2415_v37  ;;  %v1193_v2 = vpop.f32.mrb[6].mxu1 }
 0x198   : > { %v1266_v3 = vpop.f32.mrb[6].mxu0  ;;  %v1263_v4 = vadd.f32 %v1262_v59, %v1190_v61  ;;  %v1194_v5 = vadd.f32 %v1193_v2, %v2413_v36  ;;  %v1195_v6 = vpop.f32.mrb[7].mxu1  ;;  %v1422_v2 = vld [vmem:[#allocation6 + $0x38] sm:$0xff] }
 0x199   : > { %v1268_v7 = vpop.f32.mrb[7].mxu0  ;;  %v1265_v8 = vadd.f32 %v1264_v63, %v1192_v1  ;;  %v1196_v9 = vadd.f32 %v1195_v6, %v2415_v37  ;;  %1370 = vmatprep.mubr.bf16.mxu0 %v1308_v0  ;;  %v1418_v0 = vld [vmem:[#allocation6 + $0x18] sm:$0xff]  ;;  %v1420_v1 = vld [vmem:[#allocation6 + $0x28] sm:$0xff] }
 0x19a   : > { %v1267_v10 = vadd.f32 %v1266_v3, %v1194_v5  ;;  %1371 = vmatmul.mubr.bf16.vlgmr.msra.gmra.mrb[16].mxu0 %v1307_v60  ;;  %v1295_v12 = vmax.f32 %v1263_v4, 0.0  ;;  %1731 = vmatprep.subr.bf16.mxu1 %v1418_v0  ;;  %v1664_v4 = vld [vmem:[#allocation5] ss:$0 sm:$0xff] }
 0x19b   : > { %v1269_v11 = vadd.f32 %v1268_v7, %v1196_v9  ;;  %v1296_v14 = vmax.f32 %v1265_v8, 0.0  ;;  %1732 = vmatpush3.bf16.msra.mxu1 %v1418_v0 }
 0x19c   : > { %v1297_v13 = vmax.f32 %v1267_v10, 0.0 }
 0x19d   : > { %v1298_v15 = vmax.f32 %v1269_v11, 0.0  ;;  %v1199_v16 = vpop.f32.mrb[8].mxu1 }
 0x19e   : > { %v1272_v17 = vpop.f32.mrb[8].mxu0  ;;  %v1309_v18 = vpack.c.bf16 %v1297_v13, %v1295_v12  ;;  %v1200_v19 = vadd.f32 %v1199_v16, %v2413_v36  ;;  %v1201_v20 = vpop.f32.mrb[9].mxu1 }
 0x19f   : > { %v1274_v21 = vpop.f32.mrb[9].mxu0  ;;  %v1310_v22 = vpack.c.bf16 %v1298_v15, %v1296_v14  ;;  %v1202_v23 = vadd.f32 %v1201_v20, %v2415_v37  ;;  %v1203_v24 = vpop.f32.mrb[10].mxu1 }
 0x1a0   : > { %v1276_v25 = vpop.f32.mrb[10].mxu0  ;;  %v1273_v26 = vadd.f32 %v1272_v17, %v1200_v19  ;;  %v1204_v27 = vadd.f32 %v1203_v24, %v2413_v36  ;;  %v1205_v28 = vpop.f32.mrb[11].mxu1 }
 0x1a1   : > { %v1278_v29 = vpop.f32.mrb[11].mxu0  ;;  %v1275_v30 = vadd.f32 %v1274_v21, %v1202_v23  ;;  %v1206_v31 = vadd.f32 %v1205_v28, %v2415_v37  ;;  %1378 = vmatprep.mubr.bf16.mxu0 %v1310_v22 }
 0x1a2   : > { %v1277_v32 = vadd.f32 %v1276_v25, %v1204_v27  ;;  %1379 = vmatmul.mubr.bf16.gmra.mrb[20].mxu0 %v1309_v18  ;;  %v1299_v34 = vmax.f32 %v1273_v26, 0.0 }
 0x1a3   : > { %v1279_v33 = vadd.f32 %v1278_v29, %v1206_v31  ;;  %v1300_v38 = vmax.f32 %v1275_v30, 0.0 }
 0x1a4   : > { %v1301_v35 = vmax.f32 %v1277_v32, 0.0 }
 0x1a5   : > { %v1302_v39 = vmax.f32 %v1279_v33, 0.0  ;;  %v1209_v40 = vpop.f32.mrb[12].mxu1 }
 0x1a6   : > { %v1282_v41 = vpop.f32.mrb[12].mxu0  ;;  %v1311_v42 = vpack.c.bf16 %v1301_v35, %v1299_v34  ;;  %v1210_v43 = vadd.f32 %v1209_v40, %v2413_v36  ;;  %v1211_v44 = vpop.f32.mrb[13].mxu1 }
 0x1a7   : > { %v1284_v45 = vpop.f32.mrb[13].mxu0  ;;  %v1312_v46 = vpack.c.bf16 %v1302_v39, %v1300_v38  ;;  %v1212_v47 = vadd.f32 %v1211_v44, %v2415_v37  ;;  %v1213_v48 = vpop.f32.mrb[14].mxu1 }
 0x1a8   : > { %v1286_v49 = vpop.f32.mrb[14].mxu0  ;;  %v1283_v50 = vadd.f32 %v1282_v41, %v1210_v43  ;;  %v1214_v51 = vadd.f32 %v1213_v48, %v2413_v36  ;;  %v1215_v52 = vpop.f32.mrb[15].mxu1  ;;  %v1419_v36 = vld [vmem:[#allocation6 + $0x20] sm:$0xff] }
 0x1a9   : > { %v1288_v53 = vpop.f32.mrb[15].mxu0  ;;  %v1285_v54 = vadd.f32 %v1284_v45, %v1212_v47  ;;  %v1216_v55 = vadd.f32 %v1215_v52, %v2415_v37  ;;  %1386 = vmatprep.mubr.bf16.mxu0 %v1312_v46  ;;  %1733 = vmatprep.subr.bf16.mxu1 %v1419_v36  ;;  %v1421_v37 = vld [vmem:[#allocation6 + $0x30] sm:$0xff] }
 0x1aa   : > { %v1287_v56 = vadd.f32 %v1286_v49, %v1214_v51  ;;  %1387 = vmatmul.mubr.bf16.gmra.mrb[24].mxu0 %v1311_v42  ;;  %v1303_v58 = vmax.f32 %v1283_v50, 0.0  ;;  %1734 = vmatpush3.bf16.msra.mxu1 %v1419_v36  ;;  %v1665_v50 = vld [vmem:[#allocation7] ss:$0 sm:$0xff] }
 0x1ab   : > { %v1289_v57 = vadd.f32 %v1288_v53, %v1216_v55  ;;  %v1304_v60 = vmax.f32 %v1285_v54, 0.0  ;;  %1735 = vmatprep.subr.bf16.mxu1 %v1420_v1 }
 0x1ac   : > { %v1305_v59 = vmax.f32 %v1287_v56, 0.0 }
 0x1ad   : > { %v1306_v61 = vmax.f32 %v1289_v57, 0.0 }
 0x1ae   : > { %v1313_v62 = vpack.c.bf16 %v1305_v59, %v1303_v58  ;;  %1736 = vmatpush3.bf16.msra.mxu1 %v1420_v1 }
 0x1af   : > { %v1314_v63 = vpack.c.bf16 %v1306_v61, %v1304_v60  ;;  %1737 = vmatprep.subr.bf16.mxu1 %v1421_v37 }
 0x1b1   : > { %1394 = vmatprep.mubr.bf16.mxu0 %v1314_v63 }
 0x1b2   : > { %1395 = vmatmul.mubr.bf16.gmra.mrb[28].mxu0 %v1313_v62  ;;  %1738 = vmatpush3.bf16.msra.mxu1 %v1421_v37 }
 0x1b3   : > { %1739 = vmatprep.subr.bf16.mxu1 %v1422_v2 }
 0x1b6   : > { %1740 = vmatpush3.bf16.msra.mxu1 %v1422_v2 }
 0x26d   : > { %v1689_v3 = vpop.f32.mrb[16].mxu0 }
 0x26e   : > { %v1690_v5 = vpop.f32.mrb[17].mxu0 }
 0x26f   : > { %v1691_v6 = vadd.f32 %v1690_v5, %v1689_v3  ;;  %v1692_v7 = vpop.f32.mrb[18].mxu0 }
 0x270   : > { %v1693_v8 = vpop.f32.mrb[19].mxu0 }
 0x271   : > { %v1373_v9 = vadd.f32 %v1691_v6, %v1664_v4  ;;  %v1694_v10 = vadd.f32 %v1693_v8, %v1692_v7 }
 0x273   : > { %v1376_v11 = vadd.f32 %v1694_v10, %v1664_v4  ;;  %v1403_v12 = vmax.f32 %v1373_v9, 0.0 }
 0x275   : > { %v1404_v13 = vmax.f32 %v1376_v11, 0.0  ;;  %v1695_v14 = vpop.f32.mrb[20].mxu0 }
 0x276   : > { %v1696_v15 = vpop.f32.mrb[21].mxu0 }
 0x277   : > { %v1697_v16 = vadd.f32 %v1696_v15, %v1695_v14  ;;  %v1698_v17 = vpop.f32.mrb[22].mxu0  ;;  %v1411_v18 = vpack.c.bf16 %v1404_v13, %v1403_v12 }
 0x278   : > { %v1699_v19 = vpop.f32.mrb[23].mxu0 }
 0x279   : > { %v1381_v20 = vadd.f32 %v1697_v16, %v1664_v4  ;;  %v1700_v21 = vadd.f32 %v1699_v19, %v1698_v17  ;;  %1741 = vmatprep.mubr.bf16.mxu1 %v1411_v18 }
 0x27b   : > { %v1384_v22 = vadd.f32 %v1700_v21, %v1664_v4  ;;  %v1405_v23 = vmax.f32 %v1381_v20, 0.0 }
 0x27d   : > { %v1406_v24 = vmax.f32 %v1384_v22, 0.0  ;;  %v1701_v25 = vpop.f32.mrb[24].mxu0 }
 0x27e   : > { %v1702_v26 = vpop.f32.mrb[25].mxu0 }
 0x27f   : > { %v1412_v27 = vpack.c.bf16 %v1406_v24, %v1405_v23  ;;  %v1703_v28 = vadd.f32 %v1702_v26, %v1701_v25  ;;  %v1704_v29 = vpop.f32.mrb[26].mxu0 }
 0x280   : > { %v1705_v30 = vpop.f32.mrb[27].mxu0 }
 0x281   : > { %v1389_v31 = vadd.f32 %v1703_v28, %v1664_v4  ;;  %v1706_v32 = vadd.f32 %v1705_v30, %v1704_v29  ;;  %1742 = vmatmul.mubr.bf16.vlgmr.msra.gmra.mrb[16].mxu1 %v1412_v27 }
 0x283   : > { %v1392_v33 = vadd.f32 %v1706_v32, %v1664_v4  ;;  %v1407_v34 = vmax.f32 %v1389_v31, 0.0 }
 0x285   : > { %v1408_v35 = vmax.f32 %v1392_v33, 0.0  ;;  %v1707_v38 = vpop.f32.mrb[28].mxu0 }
 0x286   : > { %v1708_v39 = vpop.f32.mrb[29].mxu0 }
 0x287   : > { %v1709_v40 = vadd.f32 %v1708_v39, %v1707_v38  ;;  %v1710_v41 = vpop.f32.mrb[30].mxu0  ;;  %v1413_v42 = vpack.c.bf16 %v1408_v35, %v1407_v34 }
 0x288   : > { %v1711_v43 = vpop.f32.mrb[31].mxu0 }
 0x289   : > { %v1397_v44 = vadd.f32 %v1709_v40, %v1664_v4  ;;  %v1712_v45 = vadd.f32 %v1711_v43, %v1710_v41  ;;  %1745 = vmatprep.mubr.bf16.mxu1 %v1413_v42 }
 0x28b   : > { %v1400_v46 = vadd.f32 %v1712_v45, %v1664_v4  ;;  %v1409_v47 = vmax.f32 %v1397_v44, 0.0 }
 0x28d   : > { %v1410_v48 = vmax.f32 %v1400_v46, 0.0 }
 0x28f   : > { %v1414_v49 = vpack.c.bf16 %v1410_v48, %v1409_v47 }
 0x291   : > { %1746 = vmatmul.mubr.bf16.gmra.mrb[20].mxu1 %v1414_v49 }
 0x354   : > { %v1743_v51 = vpop.f32.mrb[16].mxu1 }
 0x355   : > { %v1473_v52 = vadd.f32 %v1743_v51, %v1665_v50  ;;  %v1464_v53 = vpop.f32.mrb[17].mxu1 }
 0x356   : > { %v1465_v54 = vadd.f32 %v1665_v50, %v1464_v53  ;;  %v1744_v55 = vpop.f32.mrb[18].mxu1 }
 0x357   : > { %1497 = vst [vmem:[%s2022_s20 + $0x10] sm:$0xff] %v1473_v52  ;;  %v1476_v56 = vadd.f32 %v1744_v55, %v1665_v50  ;;  %v1467_v57 = vpop.f32.mrb[19].mxu1 }
 0x358   : > { %1495 = vst [vmem:[%s2022_s20] sm:$0xff] %v1465_v54  ;;  %v1468_v58 = vadd.f32 %v1665_v50, %v1467_v57 }
 0x359   : > { %1498 = vst [vmem:[%s2022_s20 + $0x18] sm:$0xff] %v1476_v56 }
 0x35a   : > { %1496 = vst [vmem:[%s2022_s20 + $0x8] sm:$0xff] %v1468_v58 }
 0x364   : > { %v1747_v59 = vpop.f32.mrb[20].mxu1 }
 0x365   : > { %v1489_v60 = vadd.f32 %v1747_v59, %v1665_v50  ;;  %v1480_v61 = vpop.f32.mrb[21].mxu1 }
 0x366   : > { %v1481_v62 = vadd.f32 %v1665_v50, %v1480_v61  ;;  %v1748_v63 = vpop.f32.mrb[22].mxu1 }
 0x367   : > { %1501 = vst [vmem:[%s2022_s20 + $0x30] sm:$0xff] %v1489_v60  ;;  %v1492_v0 = vadd.f32 %v1748_v63, %v1665_v50  ;;  %v1483_v36 = vpop.f32.mrb[23].mxu1 }
 0x368   : > { %1499 = vst [vmem:[%s2022_s20 + $0x20] sm:$0xff] %v1481_v62  ;;  %v1484_v1 = vadd.f32 %v1665_v50, %v1483_v36 }
 0x369   : > { %1502 = vst [vmem:[%s2022_s20 + $0x38] sm:$0xff] %v1492_v0 }
 0x36a   : > { %1500 = vst [vmem:[%s2022_s20 + $0x28] sm:$0xff] %v1484_v1 }
 0x36b   : > { %1859 = shalt.err (!%p1856_p4)
}
 0x36c   : > { %s1860_s13 = scalar_lea.hbm %s2443_s17, 1024  ;;  %s1864_s8 = scalar_lea.hbm %s2500_s7, 3072 }
 0x36d   : > { %p1861_p7 = scmp.ne.s32.totalorder %s2443_s17, %s1860_s13  ;;  %p1865_p10 = scmp.lt.u32.totalorder %s2443_s17, %s2500_s7 }
 0x36e   : > { %p1866_p11 = scmp.lt.u32.totalorder %s1864_s8, %s1860_s13  ;;  %p1868_p13 = scmp.lt.u32.totalorder %s1860_s13, %s2443_s17 }
 0x36f   : > { %p1862_p8 = pnand %p1861_p7, %p2003_p5 }
 0x370   : > { %p1867_p12 = por %p1866_p11, %p1865_p10 }
 0x371   : > { %p1863_p9 = pneg %p1862_p8 }
 0x372   : > { %p1869_p0 = por %p1868_p13, %p1867_p12 }
 0x374   : > { %p1870_p1 = pnand %p1869_p0, %p1863_p9 }
 0x376   : > { %1873 = shalt.err (!%p1870_p1)
}
 0x377   : > { %s1923_s15 = smov 128   ;;  %s1924_s16 = smov 8  }
 0x378   : > { %1781 = dma.vmem_to_hbm [thread:$0]  (%p2003_p5), %s2445_s14, 1024, %s2443_s17, %s2452_s28, %s1923_s15, %s1923_s15, %s1924_s16  }
 0x379 PF: > { %p1787_p2 = scmp.ge.s32.totalorder %s1920_s27, 2  ;;  %s1532_s18 = sand.u32 1, %s1908_s24  }
 0x37a   : > { %s1533_s21 = scalar_lea.sflag [#allocation9], %s1532_s18 }
 0x37b   : > { %p1784_p3 = pnand %p1787_p2, %p2007_p6 }
 0x37d   : > { %1903 = dma.done.wait (!%p1784_p3), %s1533_s21, 1024  }
 0x37e   : > { %1905 = vsyncadd (!%p1784_p3), %s1533_s21, 4294966272  ;;  %p17_p4 = scmp.ge.s32.totalorder %s1990_s30, 5   ;;  %s2503_s24 = smov %s1912_s25 }
 0x37f   : > { %s2504_s25 = smov %s1916_s26  ;;  %s2505_s26 = smov %s2001_s10 }
 0x380   : > { %s2506_s27 = smov %s1990_s30  ;;  %19 = sbr.rel (!%p17_p4) target bundleno = 3 (0x3), region = 324 }
 0x387   :  { %1538 = vsyncpa [#allocation9], 1 }
 0x388   :  { %1540 = vsyncpa [#allocation9 + $0x1], 1 }

</bundles_post_ra>
